<compile_context>
chip_gen: v5e
topology: v5e:2x2
jax: 0.10.0
libtpu: 0.0.40
codegen_flags: <defaults>
</compile_context>

<pallas_src>
import jax
import jax.numpy as jnp
from jax.experimental import pallas as pl
from jax.experimental.pallas import tpu as pltpu

ACTION_DIM = 18
ACTION_DIM_PADDED = 32          # lane-friendly K for the first matmul
H1 = 128
H2 = 256
EMBED_DIM = 256
LN_EPS = 1e-5


def target_encoder_kernel(x_ref, w1_ref, b1_ref, w2_ref, b2_ref,
                          w3_ref, b3_ref, gamma_ref, beta_ref, out_ref):
    # Hoist parameter reads once per grid step (weights stay VMEM-resident).
    w1 = w1_ref[...]
    b1 = b1_ref[...]
    w2 = w2_ref[...]
    b2 = b2_ref[...]
    w3 = w3_ref[...]
    b3 = b3_ref[...]
    gamma = gamma_ref[...]
    beta = beta_ref[...]

    x = x_ref[...]

    # fc1 + ReLU (tiny f32 matmul, K padded to 32 with zero rows in w1)
    h = jnp.dot(x, w1, preferred_element_type=jnp.float32) + b1
    h = jnp.maximum(h, 0.0)

    # fc2 + ReLU (bf16 inputs, f32 accumulation)
    h = jnp.dot(h.astype(jnp.bfloat16), w2,
                preferred_element_type=jnp.float32) + b2
    h = jnp.maximum(h, 0.0)

    # fc3 (bf16 inputs, f32 accumulation)
    h = jnp.dot(h.astype(jnp.bfloat16), w3,
                preferred_element_type=jnp.float32) + b3

    # LayerNorm over the feature axis: one-pass stats (sum, sum of squares)
    # so the two cross-lane reductions are independent.
    inv_n = 1.0 / EMBED_DIM
    s1 = jnp.sum(h, axis=-1, keepdims=True)
    s2 = jnp.sum(h * h, axis=-1, keepdims=True)
    mean = s1 * inv_n
    var = jnp.maximum(s2 * inv_n - mean * mean, 0.0)
    inv = jax.lax.rsqrt(var + LN_EPS)
    out_ref[...] = ((h - mean) * inv) * gamma + beta


def _pick_tm(batch):
    """Row-tile size: full-height MXU tiles for big batches, minimal padding
    for tiny ones. 512 keeps double-buffered tiles well inside v7x VMEM."""
    if batch >= 512:
        return 512
    return max(8, ((batch + 7) // 8) * 8)


def target_encoder_forward(x, params, *, tm=None):
    w1, b1, w2, b2, w3, b3, gamma, beta = params
    B = x.shape[0]
    K = w1.shape[0]

    # Pad the action axis to the padded K used by w1 (zero features).
    if x.shape[1] != K:
        x = jnp.pad(x, ((0, 0), (0, K - x.shape[1])))
    x = x.astype(jnp.float32)

    if tm is None:
        tm = _pick_tm(B)
    Bp = pl.cdiv(B, tm) * tm
    if Bp != B:
        x = jnp.pad(x, ((0, Bp - B), (0, 0)))

    pinned = lambda i: (0, 0)   # weights / LN params: same block every step

    out = pl.pallas_call(
        target_encoder_kernel,
        out_shape=jax.ShapeDtypeStruct((Bp, EMBED_DIM), jnp.float32),
        grid_spec=pltpu.PrefetchScalarGridSpec(
            num_scalar_prefetch=0,
            grid=(Bp // tm,),
            in_specs=[
                pl.BlockSpec((tm, K), lambda i: (i, 0)),        # x (pipelined)
                pl.BlockSpec((K, H1), pinned),                  # w1
                pl.BlockSpec((1, H1), pinned),                  # b1
                pl.BlockSpec((H1, H2), pinned),                 # w2
                pl.BlockSpec((1, H2), pinned),                  # b2
                pl.BlockSpec((H2, EMBED_DIM), pinned),          # w3
                pl.BlockSpec((1, EMBED_DIM), pinned),           # b3
                pl.BlockSpec((1, EMBED_DIM), pinned),           # gamma
                pl.BlockSpec((1, EMBED_DIM), pinned),           # beta
            ],
            out_specs=pl.BlockSpec((tm, EMBED_DIM), lambda i: (i, 0)),
        ),
        compiler_params=pltpu.CompilerParams(
            dimension_semantics=("parallel",),   # shard row tiles across TCs (v7x)
        ),
    )(x, w1, b1, w2, b2, w3, b3, gamma, beta)

    return out[:B]


def init_params(key):
    """Deterministic synthetic init matching the PyTorch module's shapes.

    PyTorch nn.Linear stores weight as (out, in); we store (in, out) so the
    kernel does x @ W. w1's K axis is zero-padded 18 -> 32; w2/w3 are bf16.
    """
    k1, k2, k3 = jax.random.split(key, 3)

    def linear(k, fan_in, fan_out):
        bound = 1.0 / jnp.sqrt(fan_in)
        kw, kb = jax.random.split(k)
        w = jax.random.uniform(kw, (fan_in, fan_out), jnp.float32, -bound, bound)
        b = jax.random.uniform(kb, (1, fan_out), jnp.float32, -bound, bound)
        return w, b

    w1, b1 = linear(k1, ACTION_DIM, H1)
    w1 = jnp.pad(w1, ((0, ACTION_DIM_PADDED - ACTION_DIM), (0, 0)))  # zero K-pad
    w2, b2 = linear(k2, H1, H2)
    w3, b3 = linear(k3, H2, EMBED_DIM)
    gamma = jnp.ones((1, EMBED_DIM), jnp.float32)
    beta = jnp.zeros((1, EMBED_DIM), jnp.float32)
    return (w1, b1,
            w2.astype(jnp.bfloat16), b2,
            w3.astype(jnp.bfloat16), b3,
            gamma, beta)


def reference_forward(x, params):
    """Pure-JAX reference with the same bf16 casting scheme as the kernel."""
    w1, b1, w2, b2, w3, b3, gamma, beta = params
    K = w1.shape[0]
    x = jnp.pad(x.astype(jnp.float32), ((0, 0), (0, K - x.shape[1])))
    h = jnp.maximum(jnp.dot(x, w1, preferred_element_type=jnp.float32) + b1, 0.0)
    h = jnp.maximum(jnp.dot(h.astype(jnp.bfloat16), w2,
                            preferred_element_type=jnp.float32) + b2, 0.0)
    h = jnp.dot(h.astype(jnp.bfloat16), w3,
                preferred_element_type=jnp.float32) + b3
    mean = jnp.mean(h, axis=-1, keepdims=True)
    var = jnp.mean((h - mean) ** 2, axis=-1, keepdims=True)
    return (h - mean) * jax.lax.rsqrt(var + LN_EPS) * gamma + beta


if __name__ == "__main__":
    key = jax.random.PRNGKey(0)
    kx, kp, kx2 = jax.random.split(key, 3)
    params = init_params(kp)

    # Small deployed-batch case (B=8).
    B = 8
    x = jax.random.normal(kx, (B, ACTION_DIM), jnp.float32)
    out = target_encoder_forward(x, params)
    jax.block_until_ready(out)
    ref = reference_forward(x, params)
    assert out.shape == (B, EMBED_DIM)
    assert jnp.allclose(out, ref, atol=2e-2, rtol=2e-2)

    # Tiled case: B not a multiple of the 512-row tile -> grid=(2,), padding,
    # weights pinned across grid steps.
    B2 = 600
    x2 = jax.random.normal(kx2, (B2, ACTION_DIM), jnp.float32)
    out2 = target_encoder_forward(x2, params)
    jax.block_until_ready(out2)
    ref2 = reference_forward(x2, params)
    assert out2.shape == (B2, EMBED_DIM)
    assert jnp.allclose(out2, ref2, atol=2e-2, rtol=2e-2)

    print("KERNEL_OK")
</pallas_src>

<mosaic_0001>
module attributes {stable_mosaic.version = 11 : i64} {
  func.func @target_encoder_kernel(%arg0: i32, %arg1: memref<8x32xf32, #tpu.memory_space<vmem>>, %arg2: memref<32x128xf32, #tpu.memory_space<vmem>>, %arg3: memref<1x128xf32, #tpu.memory_space<vmem>>, %arg4: memref<128x256xbf16, #tpu.memory_space<vmem>>, %arg5: memref<1x256xf32, #tpu.memory_space<vmem>>, %arg6: memref<256x256xbf16, #tpu.memory_space<vmem>>, %arg7: memref<1x256xf32, #tpu.memory_space<vmem>>, %arg8: memref<1x256xf32, #tpu.memory_space<vmem>>, %arg9: memref<1x256xf32, #tpu.memory_space<vmem>>, %arg10: memref<8x256xf32, #tpu.memory_space<vmem>>) attributes {dimension_semantics = [#tpu.dimension_semantics<parallel>], iteration_bounds = array<i64: 1>, scalar_prefetch = 0 : i64, scratch_operands = 0 : i64, tpu.core_type = #tpu.core_type<tc>, window_params = [{transform_indices = @transform_0, window_bounds = array<i64: 8, 32>}, {pipeline_mode = #tpu.pipeline_mode<synchronous>, transform_indices = @transform_1, window_bounds = array<i64: 32, 128>}, {pipeline_mode = #tpu.pipeline_mode<synchronous>, transform_indices = @transform_2, window_bounds = array<i64: 1, 128>}, {pipeline_mode = #tpu.pipeline_mode<synchronous>, transform_indices = @transform_3, window_bounds = array<i64: 128, 256>}, {pipeline_mode = #tpu.pipeline_mode<synchronous>, transform_indices = @transform_4, window_bounds = array<i64: 1, 256>}, {pipeline_mode = #tpu.pipeline_mode<synchronous>, transform_indices = @transform_5, window_bounds = array<i64: 256, 256>}, {pipeline_mode = #tpu.pipeline_mode<synchronous>, transform_indices = @transform_6, window_bounds = array<i64: 1, 256>}, {pipeline_mode = #tpu.pipeline_mode<synchronous>, transform_indices = @transform_7, window_bounds = array<i64: 1, 256>}, {pipeline_mode = #tpu.pipeline_mode<synchronous>, transform_indices = @transform_8, window_bounds = array<i64: 1, 256>}, {transform_indices = @transform_9, window_bounds = array<i64: 8, 256>}]} {
    %c0 = arith.constant 0 : index
    %c0_0 = arith.constant 0 : index
    %0 = vector.load %arg2[%c0, %c0_0] : memref<32x128xf32, #tpu.memory_space<vmem>>, vector<32x128xf32>
    %c0_1 = arith.constant 0 : index
    %c0_2 = arith.constant 0 : index
    %1 = vector.load %arg3[%c0_1, %c0_2] : memref<1x128xf32, #tpu.memory_space<vmem>>, vector<1x128xf32>
    %c0_3 = arith.constant 0 : index
    %c0_4 = arith.constant 0 : index
    %2 = vector.load %arg4[%c0_3, %c0_4] : memref<128x256xbf16, #tpu.memory_space<vmem>>, vector<128x256xbf16>
    %c0_5 = arith.constant 0 : index
    %c0_6 = arith.constant 0 : index
    %3 = vector.load %arg5[%c0_5, %c0_6] : memref<1x256xf32, #tpu.memory_space<vmem>>, vector<1x256xf32>
    %c0_7 = arith.constant 0 : index
    %c0_8 = arith.constant 0 : index
    %4 = vector.load %arg6[%c0_7, %c0_8] : memref<256x256xbf16, #tpu.memory_space<vmem>>, vector<256x256xbf16>
    %c0_9 = arith.constant 0 : index
    %c0_10 = arith.constant 0 : index
    %5 = vector.load %arg7[%c0_9, %c0_10] : memref<1x256xf32, #tpu.memory_space<vmem>>, vector<1x256xf32>
    %c0_11 = arith.constant 0 : index
    %c0_12 = arith.constant 0 : index
    %6 = vector.load %arg8[%c0_11, %c0_12] : memref<1x256xf32, #tpu.memory_space<vmem>>, vector<1x256xf32>
    %c0_13 = arith.constant 0 : index
    %c0_14 = arith.constant 0 : index
    %7 = vector.load %arg9[%c0_13, %c0_14] : memref<1x256xf32, #tpu.memory_space<vmem>>, vector<1x256xf32>
    %c0_15 = arith.constant 0 : index
    %c0_16 = arith.constant 0 : index
    %8 = vector.load %arg1[%c0_15, %c0_16] : memref<8x32xf32, #tpu.memory_space<vmem>>, vector<8x32xf32>
    %cst = arith.constant dense<0.000000e+00> : vector<8x128xf32>
    %9 = tpu.matmul %8, %0, %cst {dimension_numbers = #tpu.dot_dimension_numbers<[1], [0], [0], [1], [0, 0, 1, 1], [], []>} : vector<8x32xf32>, vector<32x128xf32>, vector<8x128xf32> -> vector<8x128xf32>
    %10 = vector.broadcast %1 : vector<1x128xf32> to vector<8x128xf32>
    %11 = arith.addf %9, %10 : vector<8x128xf32>
    %cst_17 = arith.constant 0.000000e+00 : f32
    %12 = vector.broadcast %cst_17 : f32 to vector<8x128xf32>
    %13 = arith.maximumf %11, %12 : vector<8x128xf32>
    %14 = arith.truncf %13 : vector<8x128xf32> to vector<8x128xbf16>
    %cst_18 = arith.constant dense<0.000000e+00> : vector<8x256xf32>
    %15 = tpu.matmul %14, %2, %cst_18 {dimension_numbers = #tpu.dot_dimension_numbers<[1], [0], [0], [1], [0, 0, 1, 1], [], []>} : vector<8x128xbf16>, vector<128x256xbf16>, vector<8x256xf32> -> vector<8x256xf32>
    %16 = vector.broadcast %3 : vector<1x256xf32> to vector<8x256xf32>
    %17 = arith.addf %15, %16 : vector<8x256xf32>
    %cst_19 = arith.constant 0.000000e+00 : f32
    %18 = vector.broadcast %cst_19 : f32 to vector<8x256xf32>
    %19 = arith.maximumf %17, %18 : vector<8x256xf32>
    %20 = arith.truncf %19 : vector<8x256xf32> to vector<8x256xbf16>
    %cst_20 = arith.constant dense<0.000000e+00> : vector<8x256xf32>
    %21 = tpu.matmul %20, %4, %cst_20 {dimension_numbers = #tpu.dot_dimension_numbers<[1], [0], [0], [1], [0, 0, 1, 1], [], []>} : vector<8x256xbf16>, vector<256x256xbf16>, vector<8x256xf32> -> vector<8x256xf32>
    %22 = vector.broadcast %5 : vector<1x256xf32> to vector<8x256xf32>
    %23 = arith.addf %21, %22 : vector<8x256xf32>
    %cst_21 = arith.constant dense<0.000000e+00> : vector<8xf32>
    %24 = vector.multi_reduction <add>, %23, %cst_21 [1] : vector<8x256xf32> to vector<8xf32>
    %25 = vector.shape_cast %24 : vector<8xf32> to vector<8x1xf32>
    %26 = arith.mulf %23, %23 : vector<8x256xf32>
    %cst_22 = arith.constant dense<0.000000e+00> : vector<8xf32>
    %27 = vector.multi_reduction <add>, %26, %cst_22 [1] : vector<8x256xf32> to vector<8xf32>
    %28 = vector.shape_cast %27 : vector<8xf32> to vector<8x1xf32>
    %cst_23 = arith.constant 3.906250e-03 : f32
    %29 = vector.broadcast %cst_23 : f32 to vector<8x1xf32>
    %30 = arith.mulf %25, %29 : vector<8x1xf32>
    %cst_24 = arith.constant 3.906250e-03 : f32
    %31 = vector.broadcast %cst_24 : f32 to vector<8x1xf32>
    %32 = arith.mulf %28, %31 : vector<8x1xf32>
    %33 = arith.mulf %30, %30 : vector<8x1xf32>
    %34 = arith.subf %32, %33 : vector<8x1xf32>
    %cst_25 = arith.constant 0.000000e+00 : f32
    %35 = vector.broadcast %cst_25 : f32 to vector<8x1xf32>
    %36 = arith.maximumf %34, %35 : vector<8x1xf32>
    %cst_26 = arith.constant 9.99999974E-6 : f32
    %37 = vector.broadcast %cst_26 : f32 to vector<8x1xf32>
    %38 = arith.addf %36, %37 : vector<8x1xf32>
    %39 = math.rsqrt %38 : vector<8x1xf32>
    %40 = vector.broadcast %30 : vector<8x1xf32> to vector<8x256xf32>
    %41 = arith.subf %23, %40 : vector<8x256xf32>
    %42 = vector.broadcast %39 : vector<8x1xf32> to vector<8x256xf32>
    %43 = arith.mulf %41, %42 : vector<8x256xf32>
    %44 = vector.broadcast %6 : vector<1x256xf32> to vector<8x256xf32>
    %45 = arith.mulf %43, %44 : vector<8x256xf32>
    %46 = vector.broadcast %7 : vector<1x256xf32> to vector<8x256xf32>
    %47 = arith.addf %45, %46 : vector<8x256xf32>
    %c0_27 = arith.constant 0 : index
    %c0_28 = arith.constant 0 : index
    %48 = vector.load %arg10[%c0_27, %c0_28] : memref<8x256xf32, #tpu.memory_space<vmem>>, vector<8x256xf32>
    tpu.vector_store %arg10[%c0_27, %c0_28], %47 {strides = array<i32>} : memref<8x256xf32, #tpu.memory_space<vmem>>, vector<8x256xf32>,
    return
  }
  func.func @transform_0(%arg0: i32) -> (i32, i32) {
    %c0_i32 = arith.constant 0 : i32
    %c0_i32_0 = arith.constant 0 : i32
    return %arg0, %c0_i32 : i32, i32
  }
  func.func @transform_1(%arg0: i32) -> (i32, i32) {
    %c0_i32 = arith.constant 0 : i32
    %c0_i32_0 = arith.constant 0 : i32
    %c0_i32_1 = arith.constant 0 : i32
    return %c0_i32, %c0_i32_0 : i32, i32
  }
  func.func @transform_2(%arg0: i32) -> (i32, i32) {
    %c0_i32 = arith.constant 0 : i32
    %c0_i32_0 = arith.constant 0 : i32
    %c0_i32_1 = arith.constant 0 : i32
    return %c0_i32, %c0_i32_0 : i32, i32
  }
  func.func @transform_3(%arg0: i32) -> (i32, i32) {
    %c0_i32 = arith.constant 0 : i32
    %c0_i32_0 = arith.constant 0 : i32
    %c0_i32_1 = arith.constant 0 : i32
    return %c0_i32, %c0_i32_0 : i32, i32
  }
  func.func @transform_4(%arg0: i32) -> (i32, i32) {
    %c0_i32 = arith.constant 0 : i32
    %c0_i32_0 = arith.constant 0 : i32
    %c0_i32_1 = arith.constant 0 : i32
    return %c0_i32, %c0_i32_0 : i32, i32
  }
  func.func @transform_5(%arg0: i32) -> (i32, i32) {
    %c0_i32 = arith.constant 0 : i32
    %c0_i32_0 = arith.constant 0 : i32
    %c0_i32_1 = arith.constant 0 : i32
    return %c0_i32, %c0_i32_0 : i32, i32
  }
  func.func @transform_6(%arg0: i32) -> (i32, i32) {
    %c0_i32 = arith.constant 0 : i32
    %c0_i32_0 = arith.constant 0 : i32
    %c0_i32_1 = arith.constant 0 : i32
    return %c0_i32, %c0_i32_0 : i32, i32
  }
  func.func @transform_7(%arg0: i32) -> (i32, i32) {
    %c0_i32 = arith.constant 0 : i32
    %c0_i32_0 = arith.constant 0 : i32
    %c0_i32_1 = arith.constant 0 : i32
    return %c0_i32, %c0_i32_0 : i32, i32
  }
  func.func @transform_8(%arg0: i32) -> (i32, i32) {
    %c0_i32 = arith.constant 0 : i32
    %c0_i32_0 = arith.constant 0 : i32
    %c0_i32_1 = arith.constant 0 : i32
    return %c0_i32, %c0_i32_0 : i32, i32
  }
  func.func @transform_9(%arg0: i32) -> (i32, i32) {
    %c0_i32 = arith.constant 0 : i32
    %c0_i32_0 = arith.constant 0 : i32
    return %arg0, %c0_i32 : i32, i32
  }
}

</mosaic_0001>

<bundles_post_ra>
// kernel: tpu_custom_call.1
= control target key start
LH: loop header
LB: loop body
LE: loop exit
PB: predicated region body
PF: predicated region fallthrough
CT: control target
= control target key end

     0   :  { %14 = vsyncpa [#allocation3], 0  ;;  %s1133_s0 = inlined_call_operand.hbm [shape: f32[8,32], index: 0, kind: input, shape index: {}]   ;;  %s1134_s1 = inlined_call_operand.hbm [shape: f32[32,128], index: 1, kind: input, shape index: {}]   ;;  %s1135_s2 = inlined_call_operand.hbm [shape: f32[1,128], index: 2, kind: input, shape index: {}]   ;;  %s1136_s3 = inlined_call_operand.hbm [shape: bf16[128,256], index: 3, kind: input, shape index: {}]   ;;  %s1137_s4 = inlined_call_operand.vmem [shape: f32[1,256], index: 4, kind: input, shape index: {}]   ;;  %s1138_s5 = inlined_call_operand.hbm [shape: bf16[256,256], index: 5, kind: input, shape index: {}]   ;;  %s1139_s6 = inlined_call_operand.vmem [shape: f32[1,256], index: 6, kind: input, shape index: {}]   ;;  %s1140_s7 = inlined_call_operand.vmem [shape: f32[1,256], index: 7, kind: input, shape index: {}]   ;;  %s1141_s8 = inlined_call_operand.hbm [shape: f32[1,256], index: 8, kind: input, shape index: {}]   ;;  %s1142_s9 = inlined_call_operand.hbm [shape: f32[8,256], index: 9, kind: output, shape index: {}]  }
   0x1   :  { %15 = vsyncpa [#allocation6], 0 }
   0x2   :  { %16 = vsyncpa [#allocation9], 0 }
   0x3   :  { %17 = vsyncpa [#allocation12], 0  ;;  %s34_s11 = sshll.u32 %s1134_s1, 4  ;;  %s35_s11 = int_to_ptr.hbm [resolvable:$true] %s34_s11 }
   0x4   :  { %18 = vsyncpa [#allocation4], 0  ;;  %s1035_s12 = smov [#allocation5]   ;;  %s58_s16 = sshll.u32 %s1136_s3, 4  ;;  %s59_s16 = int_to_ptr.hbm [resolvable:$true] %s58_s16 }
   0x5   :  { %s36_s13 = sshll.u32 %s1035_s12, 4  ;;  %s1036_s17 = smov 128   ;;  %s37_s13 = int_to_ptr.vmem [resolvable:$true] %s36_s13 }
   0x6   :  { %s1037_s18 = smov 8   ;;  %s1038_s19 = smov [#allocation8]  }
   0x7   :  { %42 = dma.hbm_to_vmem [thread:$0]  %s35_s11, 512, %s37_s13, [#allocation6], %s1036_s17, %s1036_s17, %s1037_s18  }
   0x8   :  { %s60_s20 = sshll.u32 %s1038_s19, 4  ;;  %s24_s22 = sshll.u32 %s1133_s0, 4  ;;  %s61_s20 = int_to_ptr.vmem [resolvable:$true] %s60_s20  ;;  %s25_s22 = int_to_ptr.hbm [resolvable:$true] %s24_s22 }
   0x9   :  { %66 = dma.hbm_to_vmem [thread:$0]  %s59_s16, 2048, %s61_s20, [#allocation9], %s1036_s17, %s1036_s17, %s1037_s18  }
   0xa   :  { %s48_s24 = sshll.u32 %s1135_s2, 4  ;;  %s1039_s25 = smov [#allocation2]   ;;  %s49_s24 = int_to_ptr.hbm [resolvable:$true] %s48_s24 }
   0xb   :  { %s26_s26 = sshll.u32 %s1039_s25, 4  ;;  %s1040_s27 = smov [#allocation7]   ;;  %s27_s26 = int_to_ptr.vmem [resolvable:$true] %s26_s26 }
   0xc   :  { %29 = dma.hbm_to_vmem [thread:$0]  %s25_s22, 128, %s27_s26, [#allocation3]  }
   0xd   :  { %s50_s28 = sshll.u32 %s1040_s27, 4  ;;  %s73_s0 = sshll.u32 %s1138_s5, 4  ;;  %s51_s28 = int_to_ptr.vmem [resolvable:$true] %s50_s28  ;;  %s74_s0 = int_to_ptr.hbm [resolvable:$true] %s73_s0 }
   0xe   :  { %53 = dma.hbm_to_vmem [thread:$0]  %s49_s24, 16, %s51_s28, [#allocation6]  }
   0xf   :  { %s91_s12 = sshll.u32 %s1141_s8, 4  ;;  %s1041_s13 = smov [#allocation10]   ;;  %s92_s12 = int_to_ptr.hbm [resolvable:$true] %s91_s12 }
  0x10   :  { %s75_s2 = sshll.u32 %s1041_s13, 4  ;;  %s1042_s14 = smov [#allocation11]   ;;  %s76_s2 = int_to_ptr.vmem [resolvable:$true] %s75_s2 }
  0x11   :  { %81 = dma.hbm_to_vmem [thread:$0]  %s74_s0, 4096, %s76_s2, [#allocation9], %s1036_s17, %s1036_s17, %s1037_s18  }
  0x12   :  { %s93_s15 = sshll.u32 %s1042_s14, 4  ;;  %s94_s15 = int_to_ptr.vmem [resolvable:$true] %s93_s15 }
  0x13   :  { %96 = dma.hbm_to_vmem [thread:$0]  %s92_s12, 32, %s94_s15, [#allocation12]  }
  0x14   :  { %1025 = dma.done.wait [#allocation3], 128  }
  0x15   :  { %1026 = vsyncadd [#allocation3], 4294967168 }
  0x16   :  { %1027 = dma.done.wait [#allocation6], 528  }
  0x17   :  { %1028 = vsyncadd [#allocation6], 4294966768 }
  0x18   :  { %1029 = dma.done.wait [#allocation9], 6144  }
  0x19   :  { %1030 = vsyncadd [#allocation9], 4294961152 }
  0x1a   :  { %1031 = dma.done.wait [#allocation12], 32  }
  0x1b   :  { %1032 = vsyncadd [#allocation12], 4294967264  ;;  %v124_v0 = vld [vmem:[#allocation5 + $0x18] sm:$0xff]  ;;  %v123_v1 = vld [vmem:[#allocation5 + $0x10] sm:$0xff]  ;;  %vm182_vm0 = vcmask 261120   ;;  %s1043_s18 = smov [#allocation13]  }
  0x1c   :  { %198 = vmatpush.msra.mxu0 %v124_v0  ;;  %v122_v2 = vld [vmem:[#allocation5 + $0x8] sm:$0xff]  ;;  %v663_v3 = vld [vmem:[#allocation8 + $0x70] sm:$0xf]  ;;  %v812_v4 = vld [vmem:[#allocation8 + $0x74] sm:$0xf0]  ;;  %s589_s19 = sshll.u32 %s1043_s18, 4  ;;  %s590_s19 = int_to_ptr.vmem [resolvable:$true] %s589_s19 }
  0x1d   :  { %v811_v5 = vld [vmem:[#allocation8 + $0x74] sm:$0xf]  ;;  %v665_v6 = vld [vmem:[#allocation8 + $0x78] sm:$0xf0]  ;;  %v664_v7 = vor.u32 %v812_v4, %v663_v3  ;;  %v655_v9 = vld [vmem:[#allocation8 + $0x60] sm:$0xf] }
  0x1e   :  { %199 = vmatpush.msra.mxu0 %v123_v1  ;;  %v668_v8 = vor.u32 %v811_v5, %v665_v6  ;;  %v810_v10 = vld [vmem:[#allocation8 + $0x64] sm:$0xf0]  ;;  %v809_v11 = vld [vmem:[#allocation8 + $0x64] sm:$0xf]  ;;  %v657_v13 = vld [vmem:[#allocation8 + $0x68] sm:$0xf0] }
  0x1f   :  { %v121_v12 = vld [vmem:[#allocation5] sm:$0xff]  ;;  %v178_v14 = vld [vmem:[#allocation2] sm:$0xff]  ;;  %293 = vmatpush.bf16.msra.mxu1 %v664_v7  ;;  %v656_v15 = vor.u32 %v810_v10, %v655_v9  ;;  %v660_v16 = vor.u32 %v809_v11, %v657_v13  ;;  %v647_v17 = vld [vmem:[#allocation8 + $0x50] sm:$0xf] }
  0x20   :  { %200 = vmatpush.msra.mxu0 %v122_v2  ;;  %306 = vmatpush.bf16.msra.mxu2 %v668_v8  ;;  %v808_v18 = vld [vmem:[#allocation8 + $0x54] sm:$0xf0]  ;;  %v807_v19 = vld [vmem:[#allocation8 + $0x54] sm:$0xf]  ;;  %v649_v20 = vld [vmem:[#allocation8 + $0x58] sm:$0xf0] }
  0x21   :  { %v648_v21 = vor.u32 %v808_v18, %v647_v17  ;;  %v652_v22 = vor.u32 %v807_v19, %v649_v20  ;;  %v639_v23 = vld [vmem:[#allocation8 + $0x40] sm:$0xf]  ;;  %v806_v24 = vld [vmem:[#allocation8 + $0x44] sm:$0xf0]  ;;  %v805_v25 = vld [vmem:[#allocation8 + $0x44] sm:$0xf] }
  0x22   :  { %201 = vmatpush.msra.mxu0 %v121_v12  ;;  %v641_v26 = vld [vmem:[#allocation8 + $0x48] sm:$0xf0]  ;;  %v640_v27 = vor.u32 %v806_v24, %v639_v23  ;;  %v631_v29 = vld [vmem:[#allocation8 + $0x30] sm:$0xf]  ;;  %v804_v30 = vld [vmem:[#allocation8 + $0x34] sm:$0xf0] }
  0x23   :  { %604 = vmatmul.msk.f32.vlgmr.msra.gmra.mxu0 %vm182_vm0, %v178_v14  ;;  %294 = vmatpush.bf16.msra.mxu1 %v656_v15  ;;  %v644_v28 = vor.u32 %v805_v25, %v641_v26  ;;  %v803_v31 = vld [vmem:[#allocation8 + $0x34] sm:$0xf]  ;;  %v633_v32 = vld [vmem:[#allocation8 + $0x38] sm:$0xf0]  ;;  %v632_v33 = vor.u32 %v804_v30, %v631_v29  ;;  %v623_v35 = vld [vmem:[#allocation8 + $0x20] sm:$0xf] }
  0x24   :  { %307 = vmatpush.bf16.msra.mxu2 %v660_v16  ;;  %v636_v34 = vor.u32 %v803_v31, %v633_v32  ;;  %v802_v36 = vld [vmem:[#allocation8 + $0x24] sm:$0xf0]  ;;  %v801_v37 = vld [vmem:[#allocation8 + $0x24] sm:$0xf]  ;;  %v625_v38 = vld [vmem:[#allocation8 + $0x28] sm:$0xf0] }
  0x25   :  { %v624_v39 = vor.u32 %v802_v36, %v623_v35  ;;  %v628_v40 = vor.u32 %v801_v37, %v625_v38  ;;  %v615_v41 = vld [vmem:[#allocation8 + $0x10] sm:$0xf]  ;;  %v800_v42 = vld [vmem:[#allocation8 + $0x14] sm:$0xf0]  ;;  %v799_v43 = vld [vmem:[#allocation8 + $0x14] sm:$0xf] }
  0x26   :  { %v616_v44 = vor.u32 %v800_v42, %v615_v41  ;;  %v617_v45 = vld [vmem:[#allocation8 + $0x18] sm:$0xf0]  ;;  %v607_v47 = vld [vmem:[#allocation8] sm:$0xf]  ;;  %v798_v48 = vld [vmem:[#allocation8 + $0x4] sm:$0xf0] }
  0x27   :  { %295 = vmatpush.bf16.msra.mxu1 %v648_v21  ;;  %v620_v46 = vor.u32 %v799_v43, %v617_v45  ;;  %v797_v49 = vld [vmem:[#allocation8 + $0x4] sm:$0xf]  ;;  %v608_v50 = vor.u32 %v798_v48, %v607_v47  ;;  %v609_v51 = vld [vmem:[#allocation8 + $0x8] sm:$0xf0]  ;;  %v727_v53 = vld [vmem:[#allocation10 + $0x70] sm:$0xf] }
  0x28   :  { %308 = vmatpush.bf16.msra.mxu2 %v652_v22  ;;  %v612_v52 = vor.u32 %v797_v49, %v609_v51  ;;  %v828_v54 = vld [vmem:[#allocation10 + $0x74] sm:$0xf0]  ;;  %v827_v55 = vld [vmem:[#allocation10 + $0x74] sm:$0xf]  ;;  %v729_v57 = vld [vmem:[#allocation10 + $0x78] sm:$0xf0] }
  0x29   :  { %v728_v56 = vor.u32 %v828_v54, %v727_v53  ;;  %v719_v58 = vld [vmem:[#allocation10 + $0x60] sm:$0xf]  ;;  %v826_v59 = vld [vmem:[#allocation10 + $0x64] sm:$0xf0]  ;;  %v732_v60 = vor.u32 %v827_v55, %v729_v57  ;;  %v825_v61 = vld [vmem:[#allocation10 + $0x64] sm:$0xf] }
  0x2a   :  { %v721_v62 = vld [vmem:[#allocation10 + $0x68] sm:$0xf0]  ;;  %v791_v63 = vld [vmem:[#allocation10 + $0xf0] sm:$0xf]  ;;  %v720_v0 = vor.u32 %v826_v59, %v719_v58  ;;  %v844_v1 = vld [vmem:[#allocation10 + $0xf4] sm:$0xf0] }
  0x2b   :  { %296 = vmatpush.bf16.msra.mxu1 %v640_v27  ;;  %488 = vmatpush.bf16.msra.mxu3 %v728_v56  ;;  %v843_v2 = vld [vmem:[#allocation10 + $0xf4] sm:$0xf]  ;;  %v793_v3 = vld [vmem:[#allocation10 + $0xf8] sm:$0xf0]  ;;  %v724_v4 = vor.u32 %v825_v61, %v721_v62  ;;  %v792_v5 = vor.u32 %v844_v1, %v791_v63  ;;  %v711_v7 = vld [vmem:[#allocation10 + $0x50] sm:$0xf] }
  0x2c   :  { %309 = vmatpush.bf16.msra.mxu2 %v644_v28  ;;  %v796_v6 = vor.u32 %v843_v2, %v793_v3  ;;  %v824_v8 = vld [vmem:[#allocation10 + $0x54] sm:$0xf0]  ;;  %v823_v9 = vld [vmem:[#allocation10 + $0x54] sm:$0xf]  ;;  %v713_v10 = vld [vmem:[#allocation10 + $0x58] sm:$0xf0] }
  0x2d   :  { %v783_v11 = vld [vmem:[#allocation10 + $0xe0] sm:$0xf]  ;;  %v842_v12 = vld [vmem:[#allocation10 + $0xe4] sm:$0xf0]  ;;  %501 = vmatpush.bf16.msrb.mxu0 %v792_v5  ;;  %v841_v14 = vld [vmem:[#allocation10 + $0xe4] sm:$0xf]  ;;  %v712_v16 = vor.u32 %v824_v8, %v711_v7  ;;  %v716_v20 = vor.u32 %v823_v9, %v713_v10 }
  0x2e   :  { %v784_v13 = vor.u32 %v842_v12, %v783_v11  ;;  %v785_v15 = vld [vmem:[#allocation10 + $0xe8] sm:$0xf0]  ;;  %v703_v18 = vld [vmem:[#allocation10 + $0x40] sm:$0xf]  ;;  %v822_v19 = vld [vmem:[#allocation10 + $0x44] sm:$0xf0] }
  0x2f   :  { %297 = vmatpush.bf16.msra.mxu1 %v632_v33  ;;  %489 = vmatpush.bf16.msra.mxu3 %v720_v0  ;;  %v788_v17 = vor.u32 %v841_v14, %v785_v15  ;;  %v775_v21 = vld [vmem:[#allocation10 + $0xd0] sm:$0xf]  ;;  %v840_v22 = vld [vmem:[#allocation10 + $0xd4] sm:$0xf0]  ;;  %v839_v23 = vld [vmem:[#allocation10 + $0xd4] sm:$0xf]  ;;  %v704_v30 = vor.u32 %v822_v19, %v703_v18 }
  0x30   :  { %310 = vmatpush.bf16.msra.mxu2 %v636_v34  ;;  %v821_v24 = vld [vmem:[#allocation10 + $0x44] sm:$0xf]  ;;  %v705_v25 = vld [vmem:[#allocation10 + $0x48] sm:$0xf0]  ;;  %v777_v26 = vld [vmem:[#allocation10 + $0xd8] sm:$0xf0]  ;;  %v776_v27 = vor.u32 %v840_v22, %v775_v21 }
  0x31   :  { %502 = vmatpush.bf16.msrb.mxu0 %v784_v13  ;;  %v780_v28 = vor.u32 %v839_v23, %v777_v26  ;;  %v767_v29 = vld [vmem:[#allocation10 + $0xc0] sm:$0xf]  ;;  %v838_v31 = vld [vmem:[#allocation10 + $0xc4] sm:$0xf0]  ;;  %v837_v32 = vld [vmem:[#allocation10 + $0xc4] sm:$0xf]  ;;  %v708_v34 = vor.u32 %v821_v24, %v705_v25 }
  0x32   :  { %v769_v33 = vld [vmem:[#allocation10 + $0xc8] sm:$0xf0]  ;;  %v695_v35 = vld [vmem:[#allocation10 + $0x30] sm:$0xf]  ;;  %v820_v36 = vld [vmem:[#allocation10 + $0x34] sm:$0xf0] }
  0x33   :  { %298 = vmatpush.bf16.msra.mxu1 %v624_v39  ;;  %490 = vmatpush.bf16.msra.mxu3 %v712_v16  ;;  %v819_v37 = vld [vmem:[#allocation10 + $0x34] sm:$0xf]  ;;  %v697_v38 = vld [vmem:[#allocation10 + $0x38] sm:$0xf0]  ;;  %v768_v39 = vor.u32 %v838_v31, %v767_v29  ;;  %v759_v41 = vld [vmem:[#allocation10 + $0xb0] sm:$0xf]  ;;  %v696_v42 = vor.u32 %v820_v36, %v695_v35 }
  0x34   :  { %311 = vmatpush.bf16.msra.mxu2 %v628_v40  ;;  %v772_v40 = vor.u32 %v837_v32, %v769_v33  ;;  %v836_v43 = vld [vmem:[#allocation10 + $0xb4] sm:$0xf0]  ;;  %v761_v45 = vld [vmem:[#allocation10 + $0xb8] sm:$0xf0]  ;;  %v687_v47 = vld [vmem:[#allocation10 + $0x20] sm:$0xf] }
  0x35   :  { %503 = vmatpush.bf16.msrb.mxu0 %v776_v27  ;;  %v818_v48 = vld [vmem:[#allocation10 + $0x24] sm:$0xf0]  ;;  %v817_v49 = vld [vmem:[#allocation10 + $0x24] sm:$0xf]  ;;  %v760_v51 = vor.u32 %v836_v43, %v759_v41  ;;  %v854_v55 = vld [vmem:[#allocation7] ss:$0 sm:$0xff] }
  0x36   :  { %v688_v53 = vor.u32 %v818_v48, %v687_v47  ;;  %v816_v61 = vld [vmem:[#allocation10 + $0x14] sm:$0xf0]  ;;  %v815_v62 = vld [vmem:[#allocation10 + $0x14] sm:$0xf]  ;;  %v681_v0 = vld [vmem:[#allocation10 + $0x18] sm:$0xf0] }
  0x37   :  { %299 = vmatpush.bf16.msra.mxu1 %v616_v44  ;;  %491 = vmatpush.bf16.msra.mxu3 %v704_v30  ;;  %v835_v44 = vld [vmem:[#allocation10 + $0xb4] sm:$0xf]  ;;  %v684_v1 = vor.u32 %v815_v62, %v681_v0  ;;  %v751_v2 = vld [vmem:[#allocation10 + $0xa0] sm:$0xf]  ;;  %v834_v3 = vld [vmem:[#allocation10 + $0xa4] sm:$0xf0] }
  0x38   :  { %312 = vmatpush.bf16.msra.mxu2 %v620_v46  ;;  %v700_v46 = vor.u32 %v819_v37, %v697_v38  ;;  %v752_v5 = vor.u32 %v834_v3, %v751_v2  ;;  %v671_v8 = vld [vmem:[#allocation10] sm:$0xf]  ;;  %v814_v9 = vld [vmem:[#allocation10 + $0x4] sm:$0xf0]  ;;  %v813_v10 = vld [vmem:[#allocation10 + $0x4] sm:$0xf] }
  0x39   :  { %504 = vmatpush.bf16.msrb.mxu0 %v768_v39  ;;  %v672_v11 = vor.u32 %v814_v9, %v671_v8  ;;  %v673_v12 = vld [vmem:[#allocation10 + $0x8] sm:$0xf0]  ;;  %v743_v14 = vld [vmem:[#allocation10 + $0x90] sm:$0xf]  ;;  %v832_v15 = vld [vmem:[#allocation10 + $0x94] sm:$0xf0] }
  0x3a   :  { %v676_v13 = vor.u32 %v813_v10, %v673_v12  ;;  %v744_v16 = vor.u32 %v832_v15, %v743_v14  ;;  %v745_v18 = vld [vmem:[#allocation10 + $0x98] sm:$0xf0]  ;;  %v830_v21 = vld [vmem:[#allocation10 + $0x84] sm:$0xf0]  ;;  %v829_v22 = vld [vmem:[#allocation10 + $0x84] sm:$0xf] }
  0x3b   :  { %300 = vmatpush.bf16.msra.mxu1 %v608_v50  ;;  %v689_v50 = vld [vmem:[#allocation10 + $0x28] sm:$0xf0]  ;;  %492 = vmatpush.bf16.msra.mxu3 %v696_v42  ;;  %v142_v26 = vld [vmem:[%s1137_s4] sm:$0x3]  ;;  %v177_v9 = vld [vmem:[#allocation11] sm:$0x3] }
  0x3c   :  { %313 = vmatpush.bf16.msra.mxu2 %v612_v52  ;;  %v764_v52 = vor.u32 %v835_v44, %v761_v45  ;;  %v692_v54 = vor.u32 %v817_v49, %v689_v50  ;;  %v737_v24 = vld [vmem:[#allocation10 + $0x88] sm:$0xf0]  ;;  %v209_v27 = vperm.slane %v142_v26, 0  ;;  %v210_v31 = vperm.slane %v142_v26, 1 }
  0x3d   :  { %505 = vmatpush.bf16.msrb.mxu0 %v760_v51  ;;  %v740_v25 = vor.u32 %v829_v22, %v737_v24 }
  0x3f   :  { %514 = vmatpush.bf16.msrb.mxu1 %v732_v60  ;;  %493 = vmatpush.bf16.msra.mxu3 %v688_v53  ;;  %v679_v60 = vld [vmem:[#allocation10 + $0x10] sm:$0xf] }
  0x40   :  { %527 = vmatpush.bf16.msrb.mxu2 %v796_v6  ;;  %v680_v63 = vor.u32 %v816_v61, %v679_v60  ;;  %v753_v6 = vld [vmem:[#allocation10 + $0xa8] sm:$0xf0] }
  0x41   :  { %506 = vmatpush.bf16.msrb.mxu0 %v752_v5 }
  0x43   :  { %515 = vmatpush.bf16.msrb.mxu1 %v724_v4  ;;  %v833_v4 = vld [vmem:[#allocation10 + $0xa4] sm:$0xf]  ;;  %494 = vmatpush.bf16.msra.mxu3 %v680_v63 }
  0x44   :  { %528 = vmatpush.bf16.msrb.mxu2 %v788_v17  ;;  %v756_v7 = vor.u32 %v833_v4, %v753_v6  ;;  %v831_v17 = vld [vmem:[#allocation10 + $0x94] sm:$0xf] }
  0x45   :  { %v748_v19 = vor.u32 %v831_v17, %v745_v18  ;;  %507 = vmatpush.bf16.msrb.mxu0 %v744_v16  ;;  %v576_v17 = vperm.slane %v177_v9, 0  ;;  %v577_v18 = vperm.slane %v177_v9, 1 }
  0x47   :  { %516 = vmatpush.bf16.msrb.mxu1 %v716_v20  ;;  %495 = vmatpush.bf16.msra.mxu3 %v672_v11  ;;  %v735_v20 = vld [vmem:[#allocation10 + $0x80] sm:$0xf] }
  0x48   :  { %529 = vmatpush.bf16.msrb.mxu2 %v780_v28  ;;  %v736_v23 = vor.u32 %v830_v21, %v735_v20 }
  0x4a   :  { %508 = vmatpush.bf16.msrb.mxu0 %v736_v23 }
  0x4b   :  { %517 = vmatpush.bf16.msrb.mxu1 %v708_v34 }
  0x4c   :  { %530 = vmatpush.bf16.msrb.mxu2 %v772_v40  ;;  %v175_v40 = vld [vmem:[%s1139_s6] sm:$0x3] }
  0x4d   :  { %v324_v41 = vperm.slane %v175_v40, 0  ;;  %v325_v44 = vperm.slane %v175_v40, 1 }
  0x4f   :  { %518 = vmatpush.bf16.msrb.mxu1 %v700_v46 }
  0x50   :  { %531 = vmatpush.bf16.msrb.mxu2 %v764_v52 }
  0x53   :  { %519 = vmatpush.bf16.msrb.mxu1 %v692_v54 }
  0x54   :  { %532 = vmatpush.bf16.msrb.mxu2 %v756_v7  ;;  %v176_v7 = vld [vmem:[%s1140_s7] sm:$0x3]  ;;  %s591_s7 = sshll.u32 %s1142_s9, 4  ;;  %s592_s7 = int_to_ptr.hbm [resolvable:$true] %s591_s7 }
  0x55   :  { %v569_v12 = vperm.slane %v176_v7, 0 }
  0x57   :  { %520 = vmatpush.bf16.msrb.mxu1 %v684_v1 }
  0x58   :  { %533 = vmatpush.bf16.msrb.mxu2 %v748_v19 }
  0x5b   :  { %521 = vmatpush.bf16.msrb.mxu1 %v676_v13  ;;  %v570_v13 = vperm.slane %v176_v7, 1 }
  0x5c   :  { %534 = vmatpush.bf16.msrb.mxu2 %v740_v25 }
  0xa0   :  { %v203_v56 = vpop.f32.mrf.mxu0 }
  0xa1   :  { %v204_v57 = vadd.f32 %v854_v55, %v203_v56 }
  0xa3   :  { %v206_v58 = vmax.f32 %v204_v57, 0.0 }
  0xa5   :  { %v207_v59 = vpack.c.bf16 %v206_v58, %v206_v58 }
  0xa7   :  { %301 = vmatmul.bf16.vlgmr.msra.gmra.mxu1 %v207_v59  ;;  %314 = vmatmul.bf16.vlgmr.msra.gmra.mxu2 %v207_v59 }
 0x124   :  { %v302_v28 = vpop.f32.mrf.mxu1 }
 0x125   :  { %v303_v29 = vadd.f32 %v302_v28, %v209_v27 }
 0x127   :  { %v319_v30 = vmax.f32 %v303_v29, 0.0 }
 0x129   :  { %v321_v32 = vpack.c.bf16 %v319_v30, %v319_v30 }
 0x12a   :  { %v315_v33 = vpop.f32.mrf.mxu2 }
 0x12b   :  { %v316_v34 = vadd.f32 %v315_v33, %v210_v31  ;;  %496 = vmatmul.bf16.vlgmr.msra.gmra.mxu3 %v321_v32  ;;  %522 = vmatmul.bf16.vlgmr.msrb.gmra.mxu1 %v321_v32 }
 0x12c   :  { %v304_v35 = vpop.f32.mrf.mxu1 }
 0x12d   :  { %v320_v36 = vmax.f32 %v316_v34, 0.0 }
 0x12f   :  { %v322_v37 = vpack.c.bf16 %v320_v36, %v320_v36 }
 0x131   :  { %509 = vmatmul.bf16.vlgmr.msrb.gmra.mxu0 %v322_v37  ;;  %535 = vmatmul.bf16.vlgmr.msrb.gmra.mxu2 %v322_v37 }
 0x132   :  { %v317_v38 = vpop.f32.mrf.mxu2 }
 0x1a8   :  { %v523_v39 = vpop.f32.mrf.mxu1 }
 0x1a9   :  { %v524_v47 = vadd.f32 %v523_v39, %v325_v44 }
 0x1ae   :  { %v497_v42 = vpop.f32.mrf.mxu3  ;;  %v510_v43 = vpop.f32.mrf.mxu0 }
 0x1af   :  { %v498_v46 = vadd.f32 %v497_v42, %v324_v41 }
 0x1b0   :  { %v525_v45 = vpop.f32.mrf.mxu1 }
 0x1b1   :  { %v511_v49 = vadd.f32 %v510_v43, %v498_v46 }
 0x1b3   :  { %v543_v56 = vmul.f32 %v511_v49, %v511_v49 }
 0x1b4   :  { %v536_v48 = vpop.f32.mrf.mxu2 }
 0x1b5   :  { %v537_v50 = vadd.f32 %v536_v48, %v524_v47 }
 0x1b6   :  { %v499_v51 = vpop.f32.mrf.mxu3  ;;  %v512_v52 = vpop.f32.mrf.mxu0 }
 0x1b7   :  { %v540_v53 = vadd.f32 %v537_v50, %v511_v49  ;;  %v544_v54 = vmul.f32 %v537_v50, %v537_v50 }
 0x1b9   :  { %541 = vadd.xlane.f32.xlu0 %v540_v53  ;;  %v545_v57 = vadd.f32 %v544_v54, %v543_v56 }
 0x1bc   :  { %v538_v55 = vpop.f32.mrf.mxu2 }
 0x1c1   :  { %546 = vadd.xlane.f32.xlu0 %v545_v57 }
 0x22c   :  { %v542_v58 = vpop.xlane.xlu0 %541 }
 0x22d   :  { %v548_v59 = vmul.f32 0.00390625, %v542_v58 }
 0x22f   :  { %v550_v61 = vmul.f32 %v548_v59, %v548_v59  ;;  %v564_v10 = vsub.f32 %v511_v49, %v548_v59  ;;  %v565_v11 = vsub.f32 %v537_v50, %v548_v59 }
 0x234   :  { %v547_v60 = vpop.xlane.xlu0 %546 }
 0x235   :  { %v549_v62 = vmul.f32 0.00390625, %v547_v60 }
 0x237   :  { %v551_v63 = vsub.f32 %v549_v62, %v550_v61 }
 0x239   :  { %v552_v0 = vmax.f32 %v551_v63, 0.0 }
 0x23b   :  { %v553_v1 = vadd.f32 1e-05, %v552_v0 }
 0x23d   :  { %855 = vrsqrt.f32 %v553_v1  ;;  %vm560_vm2 = vweird.f32 %v553_v1 }
 0x243   :  { %v856_v2 = vpop.eup %855 }
 0x244   :  { %v555_v3 = vmul.f32 %v856_v2, %v553_v1  ;;  %vm561_vm1 = vweird.f32 %v856_v2 }
 0x245   :  { %vm562_vm3 = vmor %vm560_vm2, %vm561_vm1 }
 0x246   :  { %v556_v4 = vmul.f32 %v856_v2, %v555_v3 }
 0x248   :  { %v557_v5 = vmul.f32 0.5, %v556_v4 }
 0x24a   :  { %v558_v6 = vsub.f32 1.5, %v557_v5 }
 0x24c   :  { %v559_v8 = vmul.f32 %v856_v2, %v558_v6 }
 0x24e   :  { %v563_v14 = vsel %vm562_vm3, %v856_v2, %v559_v8 }
 0x24f   :  { %v566_v15 = vmul.f32 %v564_v10, %v563_v14  ;;  %v567_v16 = vmul.f32 %v565_v11, %v563_v14 }
 0x251   :  { %v573_v19 = vmul.f32 %v569_v12, %v566_v15  ;;  %v574_v20 = vmul.f32 %v570_v13, %v567_v16 }
 0x253   :  { %v580_v21 = vadd.f32 %v576_v17, %v573_v19  ;;  %v581_v22 = vadd.f32 %v577_v18, %v574_v20 }
 0x255   :  { %582 = vst [vmem:[#allocation13] sm:$0xff] %v580_v21 }
 0x256   :  { %583 = vst [vmem:[#allocation13 + $0x8] sm:$0xff] %v581_v22 }
 0x257   :  { %594 = dma.vmem_to_hbm [thread:$0]  %s590_s19, 256, %s592_s7, [#allocation4]  }
 0x258   :  { %1033 = dma.done.wait [#allocation4], 256  }
 0x259   :  { %1034 = vsyncadd [#allocation4], 4294967040 }
 0x25a   :  { %599 = vsyncpa [#allocation3], 1 }
 0x25b   :  { %600 = vsyncpa [#allocation6], 1 }
 0x25c   :  { %601 = vsyncpa [#allocation9], 1 }
 0x25d   :  { %602 = vsyncpa [#allocation12], 1 }
 0x25e   :  { %603 = vsyncpa [#allocation4], 1 }

</bundles_post_ra>
